<compile_context>
chip_gen: v5e
topology: v5e:2x2
jax: 0.10.0
libtpu: 0.0.40
codegen_flags: <defaults>
</compile_context>

<pallas_src>
import functools

import jax
import jax.numpy as jnp
from jax.experimental import pallas as pl
from jax.experimental.pallas import tpu as pltpu


def _round_up(x: int, m: int) -> int:
    return ((x + m - 1) // m) * m


def _make_kernel(p_drop: float, training: bool, tm: int, c: int):
    apply_dropout = training and p_drop > 0.0
    drop_all = training and p_drop >= 1.0
    keep_scale = 1.0 / (1.0 - p_drop) if (apply_dropout and not drop_all) else 1.0
    # Drop an element iff its 31-bit hash is < threshold  ->  P(drop) = p_drop.
    threshold = min(int(round(p_drop * (1 << 31))), (1 << 31) - 1)

    def kernel(seed_ref, x_ref, w_ref, b_ref, o_ref):
        x = x_ref[...]                                  # (tm, F), input dtype

        if drop_all:
            # F.dropout with p == 1.0 zeroes everything.
            x = jnp.zeros_like(x)
        elif apply_dropout:
            # Portable counter-based hash PRNG (no pltpu.prng_*): mask depends
            # only on the call seed and the global (row, col) element index.
            i = pl.program_id(0)
            rows = (jax.lax.broadcasted_iota(jnp.int32, x.shape, 0)
                    + i * tm).astype(jnp.uint32)
            cols = jax.lax.broadcasted_iota(jnp.int32, x.shape, 1).astype(jnp.uint32)
            seed = seed_ref[0].astype(jnp.uint32) * jnp.uint32(0x9E3779B1)
            h = rows * jnp.uint32(2654435761) + cols * jnp.uint32(0x85EBCA77) + seed
            # murmur3-style finalizer (good avalanche, pure VPU int ops)
            h = h ^ (h >> 16)
            h = h * jnp.uint32(0x7FEB352D)
            h = h ^ (h >> 15)
            h = h * jnp.uint32(0x846CA68B)
            h = h ^ (h >> 16)
            bits31 = (h & jnp.uint32(0x7FFFFFFF)).astype(jnp.int32)
            keep = bits31 >= jnp.int32(threshold)
            x = jnp.where(keep, x * keep_scale, 0.0)

        # bf16 MXU matmul (single K block: F fits in VMEM), f32 accumulation.
        acc = jnp.dot(x.astype(jnp.bfloat16), w_ref[...],
                      preferred_element_type=jnp.float32)
        acc = acc + b_ref[...]
        # Compact store: only the real `c` classes go back to HBM (no padded
        # 128-lane writeback, no post-kernel slice).
        o_ref[...] = acc[:, :c].astype(o_ref.dtype)

    return kernel


@functools.partial(jax.jit,
                   static_argnames=("p_drop", "training", "block_rows"))
def boot_classifier_forward(es, weight, bias, seed, *, p_drop=0.0,
                            training=False, block_rows=1024):
    """x = dropout(es, p_drop, training) @ weight.T + bias  (PyTorch nn.Linear)."""
    n, f = es.shape
    c = weight.shape[0]

    # Row tile: as large as possible (amortize per-grid-step overhead) while
    # keeping the double-buffered x block small enough for every generation
    # (<= ~4 MiB per buffer -> fine even under v5e's 16 MiB scoped default),
    # and never larger than (rounded-up) n.
    bytes_per_row = f * es.dtype.itemsize
    tm = min(block_rows, max(8, (4 * 1024 * 1024) // max(1, bytes_per_row)))
    tm = min(tm, _round_up(n, 8))
    tm = max(8, (tm // 8) * 8)
    ni = pl.cdiv(n, tm)

    # Lane-dense weights/bias for the MXU (num_class is tiny -> pad to 128
    # lanes); padded columns are zero and are never stored.  These arrays are
    # tiny and stay resident in VMEM across all row tiles.
    cp = _round_up(max(c, 128), 128)
    w_t = jnp.zeros((f, cp), jnp.bfloat16).at[:, :c].set(
        weight.astype(jnp.bfloat16).T)
    b2d = jnp.zeros((1, cp), jnp.float32).at[:, :c].set(
        bias.astype(jnp.float32)[None, :])

    kernel = _make_kernel(float(p_drop), bool(training), tm, c)

    return pl.pallas_call(
        kernel,
        out_shape=jax.ShapeDtypeStruct((n, c), jnp.float32),
        grid_spec=pltpu.PrefetchScalarGridSpec(
            num_scalar_prefetch=1,                     # runtime dropout seed
            grid=(ni,),
            in_specs=[
                pl.BlockSpec((tm, f), lambda i, s: (i, 0)),    # x rows (no pad)
                pl.BlockSpec((f, cp), lambda i, s: (0, 0)),    # W^T, resident
                pl.BlockSpec((1, cp), lambda i, s: (0, 0)),    # bias, resident
            ],
            out_specs=pl.BlockSpec((tm, c), lambda i, s: (i, 0)),
        ),
        compiler_params=pltpu.CompilerParams(
            dimension_semantics=("parallel",)),
    )(seed, es, w_t, b2d)


if __name__ == "__main__":
    opt = dict(num_feature=128, num_class=4, dropout=0.5)
    N, F, C = 256, opt["num_feature"], opt["num_class"]

    key = jax.random.PRNGKey(0)
    k_es, k_w, k_b = jax.random.split(key, 3)
    es = jax.random.normal(k_es, (N, F), dtype=jnp.float32)

    # nn.Linear params: xavier_uniform_ weight (per reset()), default-style bias.
    limit = (6.0 / (F + C)) ** 0.5
    weight = jax.random.uniform(k_w, (C, F), minval=-limit, maxval=limit,
                                dtype=jnp.float32)
    bound = 1.0 / (F ** 0.5)
    bias = jax.random.uniform(k_b, (C,), minval=-bound, maxval=bound,
                              dtype=jnp.float32)
    seed = jnp.array([123], dtype=jnp.int32)

    # Eval mode (dropout = identity): compare against a bf16-matmul reference.
    out_eval = boot_classifier_forward(es, weight, bias, seed,
                                       p_drop=opt["dropout"], training=False)
    jax.block_until_ready(out_eval)
    ref = jnp.dot(es.astype(jnp.bfloat16), weight.astype(jnp.bfloat16).T,
                  preferred_element_type=jnp.float32) + bias
    assert out_eval.shape == (N, C)
    assert jnp.allclose(out_eval, ref, rtol=2e-2, atol=2e-2), \
        float(jnp.max(jnp.abs(out_eval - ref)))

    # Training mode: in-kernel hash-PRNG dropout (keep prob 1-p, survivors
    # scaled by 1/(1-p), matching F.dropout semantics).
    out_train = boot_classifier_forward(es, weight, bias, seed,
                                        p_drop=opt["dropout"], training=True)
    jax.block_until_ready(out_train)
    assert out_train.shape == (N, C)
    assert bool(jnp.all(jnp.isfinite(out_train)))
    # Dropout must actually change the result when p > 0.
    assert not bool(jnp.allclose(out_train, out_eval))

    print("KERNEL_OK")
</pallas_src>

<mosaic_0001>
module attributes {stable_mosaic.version = 11 : i64} {
  func.func @kernel(%arg0: i32, %arg1: memref<1xi32, #tpu.memory_space<smem>>, %arg2: memref<256x128xf32, #tpu.memory_space<vmem>>, %arg3: memref<128x128xbf16, #tpu.memory_space<vmem>>, %arg4: memref<1x128xf32, #tpu.memory_space<vmem>>, %arg5: memref<256x4xf32, #tpu.memory_space<vmem>>) attributes {dimension_semantics = [#tpu.dimension_semantics<parallel>], iteration_bounds = array<i64: 1>, scalar_prefetch = 1 : i64, scratch_operands = 0 : i64, tpu.core_type = #tpu.core_type<tc>, window_params = [{transform_indices = @transform_0, window_bounds = array<i64: 256, 128>}, {pipeline_mode = #tpu.pipeline_mode<synchronous>, transform_indices = @transform_1, window_bounds = array<i64: 128, 128>}, {pipeline_mode = #tpu.pipeline_mode<synchronous>, transform_indices = @transform_2, window_bounds = array<i64: 1, 128>}, {transform_indices = @transform_3, window_bounds = array<i64: 256, 4>}]} {
    %c0 = arith.constant 0 : index
    %c0_0 = arith.constant 0 : index
    %0 = vector.load %arg2[%c0, %c0_0] : memref<256x128xf32, #tpu.memory_space<vmem>>, vector<256x128xf32>
    %1 = arith.truncf %0 : vector<256x128xf32> to vector<256x128xbf16>
    %c0_1 = arith.constant 0 : index
    %c0_2 = arith.constant 0 : index
    %2 = vector.load %arg3[%c0_1, %c0_2] : memref<128x128xbf16, #tpu.memory_space<vmem>>, vector<128x128xbf16>
    %cst = arith.constant dense<0.000000e+00> : vector<256x128xf32>
    %3 = tpu.matmul %1, %2, %cst {dimension_numbers = #tpu.dot_dimension_numbers<[1], [0], [0], [1], [0, 0, 1, 1], [], []>} : vector<256x128xbf16>, vector<128x128xbf16>, vector<256x128xf32> -> vector<256x128xf32>
    %c0_3 = arith.constant 0 : index
    %c0_4 = arith.constant 0 : index
    %4 = vector.load %arg4[%c0_3, %c0_4] : memref<1x128xf32, #tpu.memory_space<vmem>>, vector<1x128xf32>
    %5 = vector.broadcast %4 : vector<1x128xf32> to vector<256x128xf32>
    %6 = arith.addf %3, %5 : vector<256x128xf32>
    %7 = vector.extract_strided_slice %6 {offsets = [0, 0], sizes = [256, 4], strides = [1, 1]} : vector<256x128xf32> to vector<256x4xf32>
    %c0_5 = arith.constant 0 : index
    %c0_6 = arith.constant 0 : index
    %8 = vector.load %arg5[%c0_5, %c0_6] : memref<256x4xf32, #tpu.memory_space<vmem>>, vector<256x4xf32>
    tpu.vector_store %arg5[%c0_5, %c0_6], %7 {strides = array<i32>} : memref<256x4xf32, #tpu.memory_space<vmem>>, vector<256x4xf32>,
    return
  }
  func.func @transform_0(%arg0: i32, %arg1: memref<1xi32, #tpu.memory_space<smem>>) -> (i32, i32) {
    %c0_i32 = arith.constant 0 : i32
    %c0_i32_0 = arith.constant 0 : i32
    return %arg0, %c0_i32 : i32, i32
  }
  func.func @transform_1(%arg0: i32, %arg1: memref<1xi32, #tpu.memory_space<smem>>) -> (i32, i32) {
    %c0_i32 = arith.constant 0 : i32
    %c0_i32_0 = arith.constant 0 : i32
    %c0_i32_1 = arith.constant 0 : i32
    return %c0_i32, %c0_i32_0 : i32, i32
  }
  func.func @transform_2(%arg0: i32, %arg1: memref<1xi32, #tpu.memory_space<smem>>) -> (i32, i32) {
    %c0_i32 = arith.constant 0 : i32
    %c0_i32_0 = arith.constant 0 : i32
    %c0_i32_1 = arith.constant 0 : i32
    return %c0_i32, %c0_i32_0 : i32, i32
  }
  func.func @transform_3(%arg0: i32, %arg1: memref<1xi32, #tpu.memory_space<smem>>) -> (i32, i32) {
    %c0_i32 = arith.constant 0 : i32
    %c0_i32_0 = arith.constant 0 : i32
    return %arg0, %c0_i32 : i32, i32
  }
}

</mosaic_0001>

<bundles_post_ra>
// kernel: boot_classifier_forward.1
= control target key start
LH: loop header
LB: loop body
LE: loop exit
PB: predicated region body
PF: predicated region fallthrough
CT: control target
= control target key end

     0   :  { %10 = vsyncpa [#allocation5], 0  ;;  %s369_s18 = smov [#allocation4]   ;;  %s370_s19 = smov 128   ;;  %s589_s0 = inlined_call_operand.<no memory space> [shape: s32[1], index: 0, kind: input, shape index: {}]   ;;  %s590_s1 = inlined_call_operand.hbm [shape: f32[256,128], index: 1, kind: input, shape index: {}]   ;;  %s591_s2 = inlined_call_operand.vmem [shape: bf16[128,128], index: 2, kind: input, shape index: {}]   ;;  %s592_s3 = inlined_call_operand.vmem [shape: f32[1,128], index: 3, kind: input, shape index: {}]   ;;  %s593_s4 = inlined_call_operand.vmem [shape: f32[256,4], index: 4, kind: output, shape index: {}]  }
   0x1   :  { %s15_s17 = sshll.u32 %s590_s1, 4  ;;  %s17_s0 = sshll.u32 %s369_s18, 4  ;;  %s16_s17 = int_to_ptr.hbm [resolvable:$true] %s15_s17  ;;  %s18_s0 = int_to_ptr.vmem [resolvable:$true] %s17_s0 }
   0x2   :  { %s371_s20 = smov 8  }
   0x3   :  { %23 = dma.hbm_to_vmem [thread:$0]  %s16_s17, 4096, %s18_s0, [#allocation5], %s370_s19, %s370_s19, %s371_s20  }
   0x4   :  { %367 = dma.done.wait [#allocation5], 4096  }
   0x5   :  { %368 = vsyncadd [#allocation5], 4294963200  ;;  %v314_v0 = vld [vmem:[%s591_s2 + $0x38] sm:$0xff]  ;;  %v313_v1 = vld [vmem:[%s591_s2 + $0x30] sm:$0xff]  ;;  %vm237_vm0 = vcmask 31744  }
   0x6   :  { %148 = vmatpush.bf16.msra.mxu0 %v314_v0  ;;  %315 = vmatpush.bf16.msra.mxu1 %v314_v0  ;;  %v312_v2 = vld [vmem:[%s591_s2 + $0x28] sm:$0xff]  ;;  %v311_v3 = vld [vmem:[%s591_s2 + $0x20] sm:$0xff]  ;;  %v310_v4 = vld [vmem:[%s591_s2 + $0x18] sm:$0xff] }
   0x7   :  { %316 = vmatpush.bf16.msra.mxu2 %v314_v0  ;;  %317 = vmatpush.bf16.msra.mxu3 %v314_v0  ;;  %v309_v5 = vld [vmem:[%s591_s2 + $0x10] sm:$0xff]  ;;  %v308_v6 = vld [vmem:[%s591_s2 + $0x8] sm:$0xff]  ;;  %v307_v7 = vld [vmem:[%s591_s2] sm:$0xff] }
   0x8   :  { %v32_v8 = vld [vmem:[#allocation4] sm:$0xff]  ;;  %v33_v9 = vld [vmem:[#allocation4 + $0x8] sm:$0xff]  ;;  %v34_v20 = vld [vmem:[#allocation4 + $0x10] sm:$0xff] }
   0x9   :  { %v40_v10 = vld [vmem:[#allocation4 + $0x40] sm:$0xff]  ;;  %v41_v11 = vld [vmem:[#allocation4 + $0x48] sm:$0xff]  ;;  %v64_v16 = vpack.c.bf16 %v33_v9, %v32_v8  ;;  %v35_v21 = vld [vmem:[#allocation4 + $0x18] sm:$0xff] }
   0xa   :  { %149 = vmatpush.bf16.msra.mxu0 %v313_v1  ;;  %318 = vmatpush.bf16.msra.mxu1 %v313_v1  ;;  %v48_v12 = vld [vmem:[#allocation4 + $0x80] sm:$0xff]  ;;  %v49_v13 = vld [vmem:[#allocation4 + $0x88] sm:$0xff]  ;;  %v68_v17 = vpack.c.bf16 %v41_v11, %v40_v10  ;;  %v42_v22 = vld [vmem:[#allocation4 + $0x50] sm:$0xff]  ;;  %v65_v28 = vpack.c.bf16 %v35_v21, %v34_v20 }
   0xb   :  { %319 = vmatpush.bf16.msra.mxu2 %v313_v1  ;;  %320 = vmatpush.bf16.msra.mxu3 %v313_v1  ;;  %v56_v14 = vld [vmem:[#allocation4 + $0xc0] sm:$0xff]  ;;  %v57_v15 = vld [vmem:[#allocation4 + $0xc8] sm:$0xff]  ;;  %v72_v18 = vpack.c.bf16 %v49_v13, %v48_v12  ;;  %v43_v23 = vld [vmem:[#allocation4 + $0x58] sm:$0xff] }
   0xc   :  { %v76_v19 = vpack.c.bf16 %v57_v15, %v56_v14  ;;  %v50_v24 = vld [vmem:[#allocation4 + $0x90] sm:$0xff]  ;;  %v51_v25 = vld [vmem:[#allocation4 + $0x98] sm:$0xff]  ;;  %v69_v29 = vpack.c.bf16 %v43_v23, %v42_v22  ;;  %v36_v32 = vld [vmem:[#allocation4 + $0x20] sm:$0xff] }
   0xd   :  { %v58_v26 = vld [vmem:[#allocation4 + $0xd0] sm:$0xff]  ;;  %v59_v27 = vld [vmem:[#allocation4 + $0xd8] sm:$0xff]  ;;  %v73_v30 = vpack.c.bf16 %v51_v25, %v50_v24  ;;  %v37_v33 = vld [vmem:[#allocation4 + $0x28] sm:$0xff] }
   0xe   :  { %150 = vmatpush.bf16.msra.mxu0 %v312_v2  ;;  %321 = vmatpush.bf16.msra.mxu1 %v312_v2  ;;  %v77_v31 = vpack.c.bf16 %v59_v27, %v58_v26  ;;  %v44_v34 = vld [vmem:[#allocation4 + $0x60] sm:$0xff]  ;;  %v45_v35 = vld [vmem:[#allocation4 + $0x68] sm:$0xff]  ;;  %v66_v40 = vpack.c.bf16 %v37_v33, %v36_v32  ;;  %v38_v44 = vld [vmem:[#allocation4 + $0x30] sm:$0xff] }
   0xf   :  { %322 = vmatpush.bf16.msra.mxu2 %v312_v2  ;;  %323 = vmatpush.bf16.msra.mxu3 %v312_v2  ;;  %v52_v36 = vld [vmem:[#allocation4 + $0xa0] sm:$0xff]  ;;  %v53_v37 = vld [vmem:[#allocation4 + $0xa8] sm:$0xff]  ;;  %v70_v41 = vpack.c.bf16 %v45_v35, %v44_v34  ;;  %v39_v45 = vld [vmem:[#allocation4 + $0x38] sm:$0xff] }
  0x10   :  { %v60_v38 = vld [vmem:[#allocation4 + $0xe0] sm:$0xff]  ;;  %v61_v39 = vld [vmem:[#allocation4 + $0xe8] sm:$0xff]  ;;  %v74_v42 = vpack.c.bf16 %v53_v37, %v52_v36  ;;  %v46_v46 = vld [vmem:[#allocation4 + $0x70] sm:$0xff]  ;;  %v67_v52 = vpack.c.bf16 %v39_v45, %v38_v44 }
  0x11   :  { %v78_v43 = vpack.c.bf16 %v61_v39, %v60_v38  ;;  %v47_v47 = vld [vmem:[#allocation4 + $0x78] sm:$0xff]  ;;  %v54_v48 = vld [vmem:[#allocation4 + $0xb0] sm:$0xff]  ;;  %v427_v56 = vld [vmem:[%s592_s3] ss:$0 sm:$0xff] }
  0x12   :  { %151 = vmatpush.bf16.msra.mxu0 %v311_v3  ;;  %324 = vmatpush.bf16.msra.mxu1 %v311_v3  ;;  %v55_v49 = vld [vmem:[#allocation4 + $0xb8] sm:$0xff]  ;;  %v62_v50 = vld [vmem:[#allocation4 + $0xf0] sm:$0xff]  ;;  %v71_v53 = vpack.c.bf16 %v47_v47, %v46_v46 }
  0x13   :  { %325 = vmatpush.bf16.msra.mxu2 %v311_v3  ;;  %326 = vmatpush.bf16.msra.mxu3 %v311_v3  ;;  %v63_v51 = vld [vmem:[#allocation4 + $0xf8] sm:$0xff]  ;;  %v75_v54 = vpack.c.bf16 %v55_v49, %v54_v48 }
  0x14   :  { %v79_v55 = vpack.c.bf16 %v63_v51, %v62_v50 }
  0x16   :  { %152 = vmatpush.bf16.msra.mxu0 %v310_v4  ;;  %327 = vmatpush.bf16.msra.mxu1 %v310_v4 }
  0x17   :  { %328 = vmatpush.bf16.msra.mxu2 %v310_v4  ;;  %329 = vmatpush.bf16.msra.mxu3 %v310_v4 }
  0x1a   :  { %153 = vmatpush.bf16.msra.mxu0 %v309_v5  ;;  %330 = vmatpush.bf16.msra.mxu1 %v309_v5 }
  0x1b   :  { %331 = vmatpush.bf16.msra.mxu2 %v309_v5  ;;  %332 = vmatpush.bf16.msra.mxu3 %v309_v5 }
  0x1e   :  { %154 = vmatpush.bf16.msra.mxu0 %v308_v6  ;;  %333 = vmatpush.bf16.msra.mxu1 %v308_v6 }
  0x1f   :  { %334 = vmatpush.bf16.msra.mxu2 %v308_v6  ;;  %335 = vmatpush.bf16.msra.mxu3 %v308_v6 }
  0x22   :  { %155 = vmatpush.bf16.msra.mxu0 %v307_v7  ;;  %336 = vmatpush.bf16.msra.mxu1 %v307_v7 }
  0x23   :  { %337 = vmatpush.bf16.msra.mxu2 %v307_v7  ;;  %338 = vmatpush.bf16.msra.mxu3 %v307_v7 }
  0x25   :  { %156 = vmatmul.bf16.vlgmr.msra.gmra.mxu0 %v64_v16  ;;  %176 = vmatmul.bf16.vlgmr.msra.gmra.mxu1 %v68_v17 }
  0x26   :  { %196 = vmatmul.bf16.vlgmr.msra.gmra.mxu2 %v72_v18  ;;  %216 = vmatmul.bf16.vlgmr.msra.gmra.mxu3 %v76_v19 }
  0x35   :  { %161 = vmatmul.bf16.gmra.mxu0 %v65_v28  ;;  %181 = vmatmul.bf16.gmra.mxu1 %v69_v29 }
  0x36   :  { %201 = vmatmul.bf16.gmra.mxu2 %v73_v30  ;;  %221 = vmatmul.bf16.gmra.mxu3 %v77_v31 }
  0x45   :  { %166 = vmatmul.bf16.gmra.mxu0 %v66_v40  ;;  %186 = vmatmul.bf16.gmra.mxu1 %v70_v41 }
  0x46   :  { %206 = vmatmul.bf16.gmra.mxu2 %v74_v42  ;;  %226 = vmatmul.bf16.gmra.mxu3 %v78_v43 }
  0x55   :  { %171 = vmatmul.bf16.gmra.mxu0 %v67_v52  ;;  %191 = vmatmul.bf16.gmra.mxu1 %v71_v53 }
  0x56   :  { %211 = vmatmul.bf16.gmra.mxu2 %v75_v54  ;;  %231 = vmatmul.bf16.gmra.mxu3 %v79_v55 }
  0xa2   :  { %v157_v57 = vpop.f32.mrf.mxu0  ;;  %v177_v58 = vpop.f32.mrf.mxu1 }
  0xa3   :  { %v158_v59 = vadd.f32 %v427_v56, %v157_v57  ;;  %v178_v60 = vadd.f32 %v427_v56, %v177_v58 }
  0xa5   :  { %238 = vst.msk [vmem:[%s593_s4] sm:$0xff] %vm237_vm0, %v158_v59 }
  0xa6   :  { %246 = vst.msk [vmem:[%s593_s4 + $0x40] sm:$0xff] %vm237_vm0, %v178_v60 }
  0xa9   :  { %v197_v61 = vpop.f32.mrf.mxu2  ;;  %v217_v62 = vpop.f32.mrf.mxu3 }
  0xaa   :  { %v198_v63 = vadd.f32 %v427_v56, %v197_v61  ;;  %v218_v0 = vadd.f32 %v427_v56, %v217_v62  ;;  %v159_v1 = vpop.f32.mrf.mxu0  ;;  %v179_v2 = vpop.f32.mrf.mxu1 }
  0xab   :  { %v160_v3 = vadd.f32 %v427_v56, %v159_v1  ;;  %v180_v4 = vadd.f32 %v427_v56, %v179_v2 }
  0xac   :  { %254 = vst.msk [vmem:[%s593_s4 + $0x80] sm:$0xff] %vm237_vm0, %v198_v63 }
  0xad   :  { %262 = vst.msk [vmem:[%s593_s4 + $0xc0] sm:$0xff] %vm237_vm0, %v218_v0 }
  0xae   :  { %239 = vst.msk [vmem:[%s593_s4 + $0x8] sm:$0xff] %vm237_vm0, %v160_v3 }
  0xaf   :  { %247 = vst.msk [vmem:[%s593_s4 + $0x48] sm:$0xff] %vm237_vm0, %v180_v4 }
  0xb1   :  { %v199_v5 = vpop.f32.mrf.mxu2  ;;  %v219_v6 = vpop.f32.mrf.mxu3 }
  0xb2   :  { %v200_v7 = vadd.f32 %v427_v56, %v199_v5  ;;  %v220_v8 = vadd.f32 %v427_v56, %v219_v6  ;;  %v162_v9 = vpop.f32.mrf.mxu0  ;;  %v182_v10 = vpop.f32.mrf.mxu1 }
  0xb3   :  { %v163_v11 = vadd.f32 %v427_v56, %v162_v9  ;;  %v183_v12 = vadd.f32 %v427_v56, %v182_v10 }
  0xb4   :  { %255 = vst.msk [vmem:[%s593_s4 + $0x88] sm:$0xff] %vm237_vm0, %v200_v7 }
  0xb5   :  { %263 = vst.msk [vmem:[%s593_s4 + $0xc8] sm:$0xff] %vm237_vm0, %v220_v8 }
  0xb6   :  { %240 = vst.msk [vmem:[%s593_s4 + $0x10] sm:$0xff] %vm237_vm0, %v163_v11 }
  0xb7   :  { %248 = vst.msk [vmem:[%s593_s4 + $0x50] sm:$0xff] %vm237_vm0, %v183_v12 }
  0xb9   :  { %v202_v13 = vpop.f32.mrf.mxu2  ;;  %v222_v14 = vpop.f32.mrf.mxu3 }
  0xba   :  { %v203_v15 = vadd.f32 %v427_v56, %v202_v13  ;;  %v223_v16 = vadd.f32 %v427_v56, %v222_v14  ;;  %v164_v17 = vpop.f32.mrf.mxu0  ;;  %v184_v18 = vpop.f32.mrf.mxu1 }
  0xbb   :  { %v165_v19 = vadd.f32 %v427_v56, %v164_v17  ;;  %v185_v20 = vadd.f32 %v427_v56, %v184_v18 }
  0xbc   :  { %256 = vst.msk [vmem:[%s593_s4 + $0x90] sm:$0xff] %vm237_vm0, %v203_v15 }
  0xbd   :  { %264 = vst.msk [vmem:[%s593_s4 + $0xd0] sm:$0xff] %vm237_vm0, %v223_v16 }
  0xbe   :  { %241 = vst.msk [vmem:[%s593_s4 + $0x18] sm:$0xff] %vm237_vm0, %v165_v19 }
  0xbf   :  { %249 = vst.msk [vmem:[%s593_s4 + $0x58] sm:$0xff] %vm237_vm0, %v185_v20 }
  0xc1   :  { %v204_v21 = vpop.f32.mrf.mxu2  ;;  %v224_v22 = vpop.f32.mrf.mxu3 }
  0xc2   :  { %v205_v23 = vadd.f32 %v427_v56, %v204_v21  ;;  %v225_v24 = vadd.f32 %v427_v56, %v224_v22  ;;  %v167_v25 = vpop.f32.mrf.mxu0  ;;  %v187_v26 = vpop.f32.mrf.mxu1 }
  0xc3   :  { %v168_v27 = vadd.f32 %v427_v56, %v167_v25  ;;  %v188_v28 = vadd.f32 %v427_v56, %v187_v26 }
  0xc4   :  { %257 = vst.msk [vmem:[%s593_s4 + $0x98] sm:$0xff] %vm237_vm0, %v205_v23 }
  0xc5   :  { %265 = vst.msk [vmem:[%s593_s4 + $0xd8] sm:$0xff] %vm237_vm0, %v225_v24 }
  0xc6   :  { %242 = vst.msk [vmem:[%s593_s4 + $0x20] sm:$0xff] %vm237_vm0, %v168_v27 }
  0xc7   :  { %250 = vst.msk [vmem:[%s593_s4 + $0x60] sm:$0xff] %vm237_vm0, %v188_v28 }
  0xc9   :  { %v207_v29 = vpop.f32.mrf.mxu2  ;;  %v227_v30 = vpop.f32.mrf.mxu3 }
  0xca   :  { %v208_v31 = vadd.f32 %v427_v56, %v207_v29  ;;  %v228_v32 = vadd.f32 %v427_v56, %v227_v30  ;;  %v169_v33 = vpop.f32.mrf.mxu0  ;;  %v189_v34 = vpop.f32.mrf.mxu1 }
  0xcb   :  { %v170_v35 = vadd.f32 %v427_v56, %v169_v33  ;;  %v190_v36 = vadd.f32 %v427_v56, %v189_v34 }
  0xcc   :  { %258 = vst.msk [vmem:[%s593_s4 + $0xa0] sm:$0xff] %vm237_vm0, %v208_v31 }
  0xcd   :  { %266 = vst.msk [vmem:[%s593_s4 + $0xe0] sm:$0xff] %vm237_vm0, %v228_v32 }
  0xce   :  { %243 = vst.msk [vmem:[%s593_s4 + $0x28] sm:$0xff] %vm237_vm0, %v170_v35 }
  0xcf   :  { %251 = vst.msk [vmem:[%s593_s4 + $0x68] sm:$0xff] %vm237_vm0, %v190_v36 }
  0xd1   :  { %v209_v37 = vpop.f32.mrf.mxu2  ;;  %v229_v38 = vpop.f32.mrf.mxu3 }
  0xd2   :  { %v210_v39 = vadd.f32 %v427_v56, %v209_v37  ;;  %v230_v40 = vadd.f32 %v427_v56, %v229_v38  ;;  %v172_v41 = vpop.f32.mrf.mxu0  ;;  %v192_v42 = vpop.f32.mrf.mxu1 }
  0xd3   :  { %v173_v43 = vadd.f32 %v427_v56, %v172_v41  ;;  %v193_v44 = vadd.f32 %v427_v56, %v192_v42 }
  0xd4   :  { %259 = vst.msk [vmem:[%s593_s4 + $0xa8] sm:$0xff] %vm237_vm0, %v210_v39 }
  0xd5   :  { %267 = vst.msk [vmem:[%s593_s4 + $0xe8] sm:$0xff] %vm237_vm0, %v230_v40 }
  0xd6   :  { %244 = vst.msk [vmem:[%s593_s4 + $0x30] sm:$0xff] %vm237_vm0, %v173_v43 }
  0xd7   :  { %252 = vst.msk [vmem:[%s593_s4 + $0x70] sm:$0xff] %vm237_vm0, %v193_v44 }
  0xd9   :  { %v212_v45 = vpop.f32.mrf.mxu2  ;;  %v232_v46 = vpop.f32.mrf.mxu3 }
  0xda   :  { %v213_v47 = vadd.f32 %v427_v56, %v212_v45  ;;  %v233_v48 = vadd.f32 %v427_v56, %v232_v46  ;;  %v174_v49 = vpop.f32.mrf.mxu0  ;;  %v194_v50 = vpop.f32.mrf.mxu1 }
  0xdb   :  { %v175_v51 = vadd.f32 %v427_v56, %v174_v49  ;;  %v195_v52 = vadd.f32 %v427_v56, %v194_v50 }
  0xdc   :  { %260 = vst.msk [vmem:[%s593_s4 + $0xb0] sm:$0xff] %vm237_vm0, %v213_v47 }
  0xdd   :  { %268 = vst.msk [vmem:[%s593_s4 + $0xf0] sm:$0xff] %vm237_vm0, %v233_v48 }
  0xde   :  { %245 = vst.msk [vmem:[%s593_s4 + $0x38] sm:$0xff] %vm237_vm0, %v175_v51 }
  0xdf   :  { %253 = vst.msk [vmem:[%s593_s4 + $0x78] sm:$0xff] %vm237_vm0, %v195_v52 }
  0xe1   :  { %v214_v53 = vpop.f32.mrf.mxu2  ;;  %v234_v54 = vpop.f32.mrf.mxu3 }
  0xe2   :  { %v215_v55 = vadd.f32 %v427_v56, %v214_v53  ;;  %v235_v57 = vadd.f32 %v427_v56, %v234_v54 }
  0xe4   :  { %261 = vst.msk [vmem:[%s593_s4 + $0xb8] sm:$0xff] %vm237_vm0, %v215_v55 }
  0xe5   :  { %269 = vst.msk [vmem:[%s593_s4 + $0xf8] sm:$0xff] %vm237_vm0, %v235_v57 }
  0xe6   :  { %274 = vsyncpa [#allocation5], 1 }

</bundles_post_ra>
